<compile_context>
chip_gen: v6e
topology: v6e:2x2x1
jax: 0.10.0
libtpu: 0.0.40
codegen_flags: <defaults>
</compile_context>

<pallas_src>
import math

import jax
import jax.numpy as jnp
from jax.experimental import pallas as pl
from jax.experimental.pallas import tpu as pltpu


TARGET_BLOCK_BYTES = 6 * 1024 * 1024   # per input block (review: 4-8 MiB sweet spot)
VMEM_TILE_BUDGET = 24 * 1024 * 1024    # 2*in + 2*out + scratch must stay under this
VMEM_LIMIT_BYTES = 32 * 1024 * 1024    # explicit scoped-VMEM request (v5e default: 16 MiB)


# --------------------------------------------------------------------------- #
# Kernels
# --------------------------------------------------------------------------- #
def _sum_mid_kernel_direct(x_ref, o_ref):
    """x_ref: (N_t, L_t, H_t); o_ref: (N_t, H_t). Accumulate in-place (output
    block is VMEM-resident across the L axis; dtype == accumulator dtype)."""
    l_step = pl.program_id(2)

    @pl.when(l_step == 0)
    def _init():
        o_ref[...] = jnp.zeros_like(o_ref)

    o_ref[...] += jnp.sum(x_ref[...], axis=1)


def _sum_mid_kernel_scratch(x_ref, o_ref, acc_ref):
    """Same as above but with a wider accumulator (f32 for bf16/fp8, i32 for
    narrow ints); cast/store on the last L step."""
    l_step = pl.program_id(2)

    @pl.when(l_step == 0)
    def _init():
        acc_ref[...] = jnp.zeros_like(acc_ref)

    acc_ref[...] += jnp.sum(x_ref[...].astype(acc_ref.dtype), axis=1)

    @pl.when(l_step == pl.num_programs(2) - 1)
    def _finalize():
        o_ref[...] = acc_ref[...].astype(o_ref.dtype)


def _sum_last_kernel_direct(x_ref, o_ref):
    """H == 1 path. x_ref: (N_t, L_t); o_ref: (N_t, 1). Lane-axis reduce."""
    l_step = pl.program_id(1)

    @pl.when(l_step == 0)
    def _init():
        o_ref[...] = jnp.zeros_like(o_ref)

    o_ref[...] += jnp.sum(x_ref[...], axis=1, keepdims=True)


def _sum_last_kernel_scratch(x_ref, o_ref, acc_ref):
    l_step = pl.program_id(1)

    @pl.when(l_step == 0)
    def _init():
        acc_ref[...] = jnp.zeros_like(acc_ref)

    acc_ref[...] += jnp.sum(x_ref[...].astype(acc_ref.dtype), axis=1, keepdims=True)

    @pl.when(l_step == pl.num_programs(1) - 1)
    def _finalize():
        o_ref[...] = acc_ref[...].astype(o_ref.dtype)


# --------------------------------------------------------------------------- #
# Tile selection
# --------------------------------------------------------------------------- #
def _divisors(n):
    divs, d = set(), 1
    while d * d <= n:
        if n % d == 0:
            divs.add(d)
            divs.add(n // d)
        d += 1
    return sorted(divs)


def _sublane_min(itemsize):
    # Sub-32-bit dtypes pack along sublanes: bf16 min tile (16,128), i8/fp8 (32,128).
    if itemsize >= 4:
        return 8
    if itemsize == 2:
        return 16
    return 32


def _acc_dtype(dtype):
    if jnp.issubdtype(dtype, jnp.floating):
        return jnp.float32
    if jnp.issubdtype(dtype, jnp.integer):
        return jnp.int32
    return jnp.float32


def _pad_axis(x, axis, mult):
    size = x.shape[axis]
    rem = (-size) % mult
    if rem == 0:
        return x, size
    pad = [(0, 0)] * x.ndim
    pad[axis] = (0, rem)
    return jnp.pad(x, pad), size + rem


def _choose_tiles(N, L, H, itemsize, sub, target_bytes):
    """Pick (N_t, L_t, H_t) dividing (N, L, H) under the (8,128) block rules,
    spending the budget on the lane axis H first (long contiguous DMA rows and
    lane-dense stores), then the reduced axis L, then the leading axis N."""
    rows = min(sub, L)
    n_valid = [d for d in _divisors(N) if d % 8 == 0 or d == N]
    n_min = min(n_valid)

    # Lane tile: widest 128-multiple divisor that still leaves room for a
    # minimal (n_min, rows) block within the budget.
    if H % 128 == 0:
        H_t = 128
        for cand in (4096, 2048, 1024, 512, 256, 128):
            if cand <= H and H % cand == 0 and cand * rows * n_min * itemsize <= target_bytes:
                H_t = cand
                break
    else:
        H_t = H  # full extent is the only legal block width

    # Reduced-axis tile: dtype-aware sublane quantum (8/16/32) when possible.
    l_cap = max(1, target_bytes // max(1, H_t * itemsize * n_min))
    l_pref = [d for d in _divisors(L) if d % sub == 0 and d <= l_cap]
    l_ok = [d for d in _divisors(L) if (d % 8 == 0 or d == L) and d <= l_cap]
    if l_pref:
        L_t = max(l_pref)
    elif l_ok:
        L_t = max(l_ok)
    else:
        L_t = L  # awkward L; caller's footprint guard handles it

    # Leading tile: whatever budget remains, preferring the packing quantum.
    n_cap = max(1, target_bytes // max(1, H_t * itemsize * L_t))
    fitting = [d for d in n_valid if d <= n_cap]
    if fitting:
        n_pref = [d for d in fitting if d % sub == 0]
        N_t = max(n_pref) if n_pref else max(fitting)
    else:
        N_t = n_min

    # Keep >= 2 parallel grid iterations when possible so both v7x TensorCores
    # get work (no effect on single-core v5e / v6e).
    if (N // N_t) * (H // H_t) < 2:
        smaller = [d for d in n_valid if d < N_t]
        if smaller:
            N_t = max(smaller)
        elif H_t >= 256 and (H_t // 2) % 128 == 0 and H % (H_t // 2) == 0:
            H_t //= 2
    return N_t, L_t, H_t


def _choose_tiles_2d(N, L, itemsize, sub, target_bytes):
    """Tiles for the H == 1 case: x is (N, L), reduced over the lane axis L so
    loads stay lane-dense instead of degenerating to width-1 transfers."""
    n_valid = [d for d in _divisors(N) if d % 8 == 0 or d == N]
    n_min = min(n_valid)

    if L % 128 == 0:
        l_cap = max(128, target_bytes // max(1, n_min * itemsize))
        l_ok = [d for d in _divisors(L) if d % 128 == 0 and d <= l_cap]
        L_t = max(l_ok) if l_ok else 128
    else:
        L_t = L

    n_cap = max(1, target_bytes // max(1, L_t * itemsize))
    fitting = [d for d in n_valid if d <= n_cap]
    if fitting:
        n_pref = [d for d in fitting if d % sub == 0]
        N_t = max(n_pref) if n_pref else max(fitting)
    else:
        N_t = n_min

    if N // N_t < 2:
        smaller = [d for d in n_valid if d < N_t]
        if smaller:
            N_t = max(smaller)
    return N_t, L_t


# --------------------------------------------------------------------------- #
# pallas_call wrappers
# --------------------------------------------------------------------------- #
def _sum_mid_axis(xv, sub, acc_dtype, out_dtype, itemsize, target_bytes):
    N, L, H = xv.shape
    out_isz = jnp.dtype(out_dtype).itemsize
    acc_isz = jnp.dtype(acc_dtype).itemsize

    def footprint(n_t, l_t, h_t):  # conservative: counts scratch even if unused
        return (2 * n_t * l_t * h_t * itemsize
                + 2 * n_t * h_t * out_isz + n_t * h_t * acc_isz)

    N_w, L_w, H_w = N, L, H
    tiles = _choose_tiles(N_w, L_w, H_w, itemsize, sub, target_bytes)
    if footprint(*tiles) > VMEM_TILE_BUDGET:
        # Awkward divisor structure (non-128 H, prime L/N, ...): zero-pad to
        # friendly multiples. Zeros along L are sum-neutral; padded N/H
        # rows/cols are sliced off the output below.
        xv, N_w = _pad_axis(xv, 0, 8)
        xv, L_w = _pad_axis(xv, 1, sub)
        xv, H_w = _pad_axis(xv, 2, 128)
        tiles = _choose_tiles(N_w, L_w, H_w, itemsize, sub, target_bytes)
    # TODO(synk): a cdiv grid with masked edge blocks would avoid the pad copy.
    N_t, L_t, H_t = tiles
    grid = (N_w // N_t, H_w // H_t, L_w // L_t)

    direct = jnp.dtype(out_dtype) == jnp.dtype(acc_dtype)
    kernel = _sum_mid_kernel_direct if direct else _sum_mid_kernel_scratch
    scratch = [] if direct else [pltpu.VMEM((N_t, H_t), acc_dtype)]

    out = pl.pallas_call(
        kernel,
        out_shape=jax.ShapeDtypeStruct((N_w, H_w), out_dtype),
        grid_spec=pltpu.PrefetchScalarGridSpec(
            num_scalar_prefetch=0,
            grid=grid,
            in_specs=[pl.BlockSpec((N_t, L_t, H_t), lambda n, h, l: (n, l, h))],
            # Same output block across the L axis -> VMEM-resident accumulator.
            out_specs=pl.BlockSpec((N_t, H_t), lambda n, h, l: (n, h)),
            scratch_shapes=scratch,
        ),
        compiler_params=pltpu.CompilerParams(
            dimension_semantics=("parallel", "parallel", "arbitrary"),
            vmem_limit_bytes=VMEM_LIMIT_BYTES,
        ),
        cost_estimate=pl.CostEstimate(
            flops=xv.size,
            transcendentals=0,
            bytes_accessed=xv.size * itemsize + N_w * H_w * out_isz,
        ),
    )(xv)

    if (N_w, H_w) != (N, H):
        out = out[:N, :H]
    return out


def _sum_last_axis(xv, sub, acc_dtype, out_dtype, itemsize, target_bytes):
    N, L = xv.shape
    out_isz = jnp.dtype(out_dtype).itemsize
    acc_isz = jnp.dtype(acc_dtype).itemsize

    def footprint(n_t, l_t):
        return 2 * n_t * l_t * itemsize + 2 * n_t * out_isz + n_t * acc_isz

    N_w, L_w = N, L
    tiles = _choose_tiles_2d(N_w, L_w, itemsize, sub, target_bytes)
    if footprint(*tiles) > VMEM_TILE_BUDGET:
        xv, N_w = _pad_axis(xv, 0, 8)
        xv, L_w = _pad_axis(xv, 1, 128)   # zero columns are sum-neutral
        tiles = _choose_tiles_2d(N_w, L_w, itemsize, sub, target_bytes)
    N_t, L_t = tiles
    grid = (N_w // N_t, L_w // L_t)

    direct = jnp.dtype(out_dtype) == jnp.dtype(acc_dtype)
    kernel = _sum_last_kernel_direct if direct else _sum_last_kernel_scratch
    scratch = [] if direct else [pltpu.VMEM((N_t, 1), acc_dtype)]

    out = pl.pallas_call(
        kernel,
        out_shape=jax.ShapeDtypeStruct((N_w, 1), out_dtype),
        grid_spec=pltpu.PrefetchScalarGridSpec(
            num_scalar_prefetch=0,
            grid=grid,
            in_specs=[pl.BlockSpec((N_t, L_t), lambda n, l: (n, l))],
            out_specs=pl.BlockSpec((N_t, 1), lambda n, l: (n, 0)),
            scratch_shapes=scratch,
        ),
        compiler_params=pltpu.CompilerParams(
            dimension_semantics=("parallel", "arbitrary"),
            vmem_limit_bytes=VMEM_LIMIT_BYTES,
        ),
        cost_estimate=pl.CostEstimate(
            flops=xv.size,
            transcendentals=0,
            bytes_accessed=xv.size * itemsize + N_w * out_isz,
        ),
    )(xv)

    if N_w != N:
        out = out[:N]
    return out[:, 0]


def embedding_adder(x, dim=2, target_block_bytes=TARGET_BLOCK_BYTES):
    """Pallas TPU equivalent of EmbeddingAdder.forward (x.sum(dim=dim))."""
    ndim = x.ndim
    if dim < 0:
        dim += ndim
    assert 0 <= dim < ndim, "invalid reduction dim"
    out_shape = x.shape[:dim] + x.shape[dim + 1:]

    N = math.prod(x.shape[:dim]) if dim > 0 else 1
    L = x.shape[dim]
    H = math.prod(x.shape[dim + 1:]) if dim + 1 < ndim else 1

    if x.size == 0:
        return jnp.zeros(out_shape, x.dtype)

    itemsize = jnp.dtype(x.dtype).itemsize
    sub = _sublane_min(itemsize)
    acc_dtype = _acc_dtype(x.dtype)
    out_dtype = x.dtype
    # TODO(synk): torch promotes bool / small-int sums to int64; we keep the
    # input dtype (accumulating in int32 / float32), matching jnp.sum-on-TPU.

    if H == 1:
        out = _sum_last_axis(x.reshape(N, L), sub, acc_dtype, out_dtype,
                             itemsize, target_block_bytes)
    else:
        out = _sum_mid_axis(x.reshape(N, L, H), sub, acc_dtype, out_dtype,
                            itemsize, target_block_bytes)
    return out.reshape(out_shape)


if __name__ == "__main__":
    key = jax.random.PRNGKey(0)
    k0, k1, k2, k3 = jax.random.split(key, 4)

    # Default 4-D layout implied by the module: [batch, channels, length, hidden].
    x = jax.random.normal(k0, (2, 4, 16, 32), dtype=jnp.float32)
    out = jax.block_until_ready(embedding_adder(x, dim=2))
    ref = jnp.sum(x, axis=2)
    assert out.shape == ref.shape == (2, 4, 32)
    assert jnp.allclose(out, ref, atol=1e-4, rtol=1e-4)

    # bf16 input -> f32 scratch-accumulator path (dtype-aware sublane tiles).
    xb = jax.random.normal(k1, (2, 4, 64, 256), dtype=jnp.float32).astype(jnp.bfloat16)
    outb = jax.block_until_ready(embedding_adder(xb, dim=2))
    refb = jnp.sum(xb.astype(jnp.float32), axis=2)
    assert jnp.allclose(outb.astype(jnp.float32), refb, atol=5e-1, rtol=2e-2)

    # Small block budget to force a multi-step reduction and a tiled lane axis.
    x2 = jax.random.normal(k2, (2, 4, 128, 256), dtype=jnp.float32)
    out2 = jax.block_until_ready(embedding_adder(x2, dim=2, target_block_bytes=64 * 1024))
    ref2 = jnp.sum(x2, axis=2)
    assert jnp.allclose(out2, ref2, atol=1e-4, rtol=1e-4)

    # H == 1: reduction over the trailing axis (lane-dense 2-D path).
    x3 = jax.random.normal(k3, (2, 4, 16), dtype=jnp.float32)
    out3 = jax.block_until_ready(embedding_adder(x3, dim=2))
    ref3 = jnp.sum(x3, axis=2)
    assert jnp.allclose(out3, ref3, atol=1e-4, rtol=1e-4)

    # Integer input -> exact int32 accumulation (no float round-off).
    xi = jax.random.randint(k0, (2, 4, 16, 32), -10, 10, dtype=jnp.int32)
    outi = jax.block_until_ready(embedding_adder(xi, dim=2))
    refi = jnp.sum(xi, axis=2)
    assert jnp.array_equal(outi, refi)

    print("KERNEL_OK")
</pallas_src>

<mosaic_0001>
module attributes {stable_mosaic.version = 11 : i64} {
  func.func @_sum_mid_kernel_direct(%arg0: i32, %arg1: i32, %arg2: i32, %arg3: memref<8x16x32xf32, #tpu.memory_space<vmem>>, %arg4: memref<8x32xf32, #tpu.memory_space<vmem>>) attributes {dimension_semantics = [#tpu.dimension_semantics<parallel>, #tpu.dimension_semantics<parallel>, #tpu.dimension_semantics<arbitrary>], iteration_bounds = array<i64: 1, 1, 1>, scalar_prefetch = 0 : i64, scratch_operands = 0 : i64, tpu.core_type = #tpu.core_type<tc>, window_params = [{transform_indices = @transform_0, window_bounds = array<i64: 8, 16, 32>}, {transform_indices = @transform_1, window_bounds = array<i64: 8, 32>}]} {
    %c0_i32 = arith.constant 0 : i32
    %0 = arith.cmpi eq, %arg2, %c0_i32 : i32
    %1 = arith.extui %0 : i1 to i32
    %c0_i32_0 = arith.constant 0 : i32
    %2 = arith.cmpi ne, %1, %c0_i32_0 : i32
    scf.if %2 {
      %cst_7 = arith.constant 0.000000e+00 : f32
      %8 = vector.broadcast %cst_7 : f32 to vector<8x32xf32>
      %c0_8 = arith.constant 0 : index
      %c0_9 = arith.constant 0 : index
      %9 = vector.load %arg4[%c0_8, %c0_9] : memref<8x32xf32, #tpu.memory_space<vmem>>, vector<8x32xf32>
      tpu.vector_store %arg4[%c0_8, %c0_9], %8 {strides = array<i32>} : memref<8x32xf32, #tpu.memory_space<vmem>>, vector<8x32xf32>,
    } else {
    }
    %c0 = arith.constant 0 : index
    %c0_1 = arith.constant 0 : index
    %3 = vector.load %arg4[%c0, %c0_1] : memref<8x32xf32, #tpu.memory_space<vmem>>, vector<8x32xf32>
    %c0_2 = arith.constant 0 : index
    %c0_3 = arith.constant 0 : index
    %c0_4 = arith.constant 0 : index
    %4 = vector.load %arg3[%c0_2, %c0_3, %c0_4] : memref<8x16x32xf32, #tpu.memory_space<vmem>>, vector<8x16x32xf32>
    %cst = arith.constant dense<0.000000e+00> : vector<8x32xf32>
    %5 = vector.multi_reduction <add>, %4, %cst [1] : vector<8x16x32xf32> to vector<8x32xf32>
    %6 = arith.addf %3, %5 : vector<8x32xf32>
    %c0_5 = arith.constant 0 : index
    %c0_6 = arith.constant 0 : index
    %7 = vector.load %arg4[%c0_5, %c0_6] : memref<8x32xf32, #tpu.memory_space<vmem>>, vector<8x32xf32>
    tpu.vector_store %arg4[%c0_5, %c0_6], %6 {strides = array<i32>} : memref<8x32xf32, #tpu.memory_space<vmem>>, vector<8x32xf32>,
    return
  }
  func.func @transform_0(%arg0: i32, %arg1: i32, %arg2: i32) -> (i32, i32, i32) {
    %c0_i32 = arith.constant 0 : i32
    return %arg0, %arg2, %arg1 : i32, i32, i32
  }
  func.func @transform_1(%arg0: i32, %arg1: i32, %arg2: i32) -> (i32, i32) {
    %c0_i32 = arith.constant 0 : i32
    return %arg0, %arg1 : i32, i32
  }
}

</mosaic_0001>

<bundles_post_ra>
// kernel: tpu_custom_call.1
= control target key start
LH: loop header
LB: loop body
LE: loop exit
PB: predicated region body
PF: predicated region fallthrough
CT: control target
= control target key end

     0   :  { %6 = vsyncpa [#allocation3], 0  ;;  %s250_s0 = inlined_call_operand.hbm [shape: f32[8,16,32], index: 0, kind: input, shape index: {}]   ;;  %s251_s1 = inlined_call_operand.hbm [shape: f32[8,32], index: 1, kind: output, shape index: {}]  }
   0x1   :  { %7 = vsyncpa [#allocation4], 0  ;;  %s208_s6 = smov [#allocation2]  }
   0x2   :  { %s13_s7 = sshll.u32 %s208_s6, 4  ;;  %s14_s7 = int_to_ptr.vmem [resolvable:$true] %s13_s7 }
   0x3   :  { %s172_s8 = scalar_lea.vmem %s14_s7, 2048  ;;  %p177_p1 = scmp.lt.s32.totalorder %s14_s7, %s14_s7 }
   0x4   :  { %p173_p0 = scmp.ne.s32.totalorder %s14_s7, %s172_s8  ;;  %p178_p2 = scmp.lt.s32.totalorder %s172_s8, %s172_s8 }
   0x6   :  { %p179_p3 = por %p178_p2, %p177_p1 }
   0x8   :  { %p180_p4 = pnand %p179_p3, %p173_p0 }
   0xa   :  { %183 = shalt.err (!%p180_p4)
}
   0xb   :  { %s209_s9 = smov 128   ;;  %s210_s10 = smov 8  }
   0xc   :  { %19 = dma.hbm_to_vmem [thread:$0]  %s250_s0, 2048, %s14_s7, [#allocation3], %s209_s9, %s209_s9, %s210_s10  }
   0xd   :  { %204 = dma.done.wait [#allocation3], 2048  }
   0xe   :  { %205 = vsyncadd [#allocation3], 4294965248  ;;  %vm27_vm0 = vcmask 261120   ;;  %v211_v0 = vmov 0.0   ;;  %v30_v1 = vld [vmem:[#allocation2] sm:$0xff]  ;;  %v31_v2 = vld [vmem:[#allocation2 + $0x8] sm:$0xff] }
   0xf   :  { %28 = vst.msk [vmem:[#allocation5] sm:$0xff] %vm27_vm0, %v211_v0  ;;  %v32_v3 = vld [vmem:[#allocation2 + $0x10] sm:$0xff]  ;;  %v33_v4 = vld [vmem:[#allocation2 + $0x18] sm:$0xff]  ;;  %v34_v5 = vld [vmem:[#allocation2 + $0x20] sm:$0xff]  ;;  %v47_v6 = vsel %vm27_vm0, %v30_v1, 0.0  ;;  %v48_v7 = vsel %vm27_vm0, %v31_v2, 0.0 }
  0x10   :  { %v56_v8 = vsel %vm27_vm0, %v32_v3, 0.0  ;;  %v35_v9 = vld [vmem:[#allocation2 + $0x28] sm:$0xff]  ;;  %v36_v10 = vld [vmem:[#allocation2 + $0x30] sm:$0xff]  ;;  %v37_v11 = vld [vmem:[#allocation2 + $0x38] sm:$0xff]  ;;  %v49_v12 = vadd.f32 %v48_v7, %v47_v6  ;;  %v57_v13 = vsel %vm27_vm0, %v33_v4, 0.0  ;;  %v65_v14 = vsel %vm27_vm0, %v34_v5, 0.0 }
  0x11   :  { %v38_v15 = vld [vmem:[#allocation2 + $0x40] sm:$0xff]  ;;  %v39_v16 = vld [vmem:[#allocation2 + $0x48] sm:$0xff]  ;;  %v40_v17 = vld [vmem:[#allocation2 + $0x50] sm:$0xff]  ;;  %v58_v18 = vadd.f32 %v57_v13, %v56_v8  ;;  %v66_v19 = vsel %vm27_vm0, %v35_v9, 0.0  ;;  %v74_v20 = vsel %vm27_vm0, %v36_v10, 0.0  ;;  %v75_v21 = vsel %vm27_vm0, %v37_v11, 0.0 }
  0x12   :  { %v41_v22 = vld [vmem:[#allocation2 + $0x58] sm:$0xff]  ;;  %v42_v23 = vld [vmem:[#allocation2 + $0x60] sm:$0xff]  ;;  %v43_v24 = vld [vmem:[#allocation2 + $0x68] sm:$0xff]  ;;  %v50_v25 = vrot.slane %v49_v12, 4  ;;  %v67_v26 = vadd.f32 %v66_v19, %v65_v14  ;;  %v76_v27 = vadd.f32 %v75_v21, %v74_v20  ;;  %v83_v28 = vsel %vm27_vm0, %v38_v15, 0.0  ;;  %s212_s0 = smov [#allocation5]  }
  0x13   :  { %v59_v29 = vrot.slane %v58_v18, 4  ;;  %v84_v30 = vsel %vm27_vm0, %v39_v16, 0.0  ;;  %v92_v31 = vsel %vm27_vm0, %v40_v17, 0.0  ;;  %v93_v32 = vsel %vm27_vm0, %v41_v22, 0.0  ;;  %v44_v33 = vld [vmem:[#allocation2 + $0x70] sm:$0xff]  ;;  %v45_v42 = vld [vmem:[#allocation2 + $0x78] sm:$0xff] }
  0x14   :  { %v51_v34 = vadd.f32 %v50_v25, %v49_v12  ;;  %v68_v35 = vrot.slane %v67_v26, 4  ;;  %v77_v36 = vrot.slane %v76_v27, 4  ;;  %v85_v37 = vadd.f32 %v84_v30, %v83_v28  ;;  %s150_s13 = sshll.u32 %s212_s0, 4  ;;  %s151_s13 = int_to_ptr.vmem [resolvable:$true] %s150_s13 }
  0x15   :  { %vm127_vm1 = vcmask 1041409   ;;  %v60_v38 = vadd.f32 %v59_v29, %v58_v18  ;;  %v94_v39 = vadd.f32 %v93_v32, %v92_v31  ;;  %v101_v40 = vsel %vm27_vm0, %v42_v23, 0.0  ;;  %s184_s14 = scalar_lea.vmem %s151_s13, 128  ;;  %p189_p6 = scmp.lt.s32.totalorder %s151_s13, %s151_s13 }
  0x16   :  { %v102_v41 = vsel %vm27_vm0, %v43_v24, 0.0  ;;  %vm129_vm2 = vcmask 1042434   ;;  %v52_v43 = vrot.slane %v51_v34, 2  ;;  %v69_v44 = vadd.f32 %v68_v35, %v67_v26  ;;  %v29_v30 = vld [vmem:[#allocation5] sm:$0xff]  ;;  %p185_p5 = scmp.ne.s32.totalorder %s151_s13, %s184_s14  ;;  %p190_p7 = scmp.lt.s32.totalorder %s184_s14, %s184_s14 }
  0x17   :  { %v78_v45 = vadd.f32 %v77_v36, %v76_v27  ;;  %v86_v46 = vrot.slane %v85_v37, 4  ;;  %vm131_vm3 = vcmask 1043459   ;;  %v61_v47 = vrot.slane %v60_v38, 2 }
  0x18   :  { %v95_v48 = vrot.slane %v94_v39, 4  ;;  %v103_v49 = vadd.f32 %v102_v41, %v101_v40  ;;  %v110_v50 = vsel %vm27_vm0, %v44_v33, 0.0  ;;  %v53_v51 = vadd.f32 %v52_v43, %v51_v34  ;;  %p191_p8 = por %p190_p7, %p189_p6 }
  0x19   :  { %v70_v52 = vrot.slane %v69_v44, 2  ;;  %v79_v53 = vrot.slane %v78_v45, 2  ;;  %v87_v54 = vadd.f32 %v86_v46, %v85_v37  ;;  %v62_v55 = vadd.f32 %v61_v47, %v60_v38 }
  0x1a   :  { %v96_v56 = vadd.f32 %v95_v48, %v94_v39  ;;  %v104_v57 = vrot.slane %v103_v49, 4  ;;  %v111_v58 = vsel %vm27_vm0, %v45_v42, 0.0  ;;  %v54_v59 = vrot.slane %v53_v51, 1  ;;  %p192_p9 = pnand %p191_p8, %p185_p5 }
  0x1b   :  { %v71_v60 = vadd.f32 %v70_v52, %v69_v44  ;;  %v80_v61 = vadd.f32 %v79_v53, %v78_v45  ;;  %v88_v62 = vrot.slane %v87_v54, 2  ;;  %v63_v63 = vrot.slane %v62_v55, 1 }
  0x1c   :  { %v97_v0 = vrot.slane %v96_v56, 2  ;;  %v105_v1 = vadd.f32 %v104_v57, %v103_v49  ;;  %v112_v2 = vadd.f32 %v111_v58, %v110_v50  ;;  %v55_v3 = vadd.f32 %v54_v59, %v53_v51 }
  0x1d   :  { %v72_v4 = vrot.slane %v71_v60, 1  ;;  %v81_v5 = vrot.slane %v80_v61, 1  ;;  %v89_v6 = vadd.f32 %v88_v62, %v87_v54  ;;  %v64_v7 = vadd.f32 %v63_v63, %v62_v55 }
  0x1e   :  { %v98_v8 = vadd.f32 %v97_v0, %v96_v56  ;;  %v106_v9 = vrot.slane %v105_v1, 2  ;;  %v113_v10 = vrot.slane %v112_v2, 4  ;;  %vm133_vm4 = vcmask 1044484  }
  0x1f   :  { %v73_v11 = vadd.f32 %v72_v4, %v71_v60  ;;  %v82_v12 = vadd.f32 %v81_v5, %v80_v61  ;;  %v90_v13 = vrot.slane %v89_v6, 1  ;;  %v128_v17 = vsel %vm127_vm1, %v64_v7, %v55_v3 }
  0x20   :  { %v99_v14 = vrot.slane %v98_v8, 1  ;;  %v107_v15 = vadd.f32 %v106_v9, %v105_v1  ;;  %v114_v16 = vadd.f32 %v113_v10, %v112_v2  ;;  %vm135_vm5 = vcmask 1045509  }
  0x21   :  { %v91_v18 = vadd.f32 %v90_v13, %v89_v6  ;;  %v130_v19 = vsel %vm129_vm2, %v73_v11, %v128_v17  ;;  %vm137_vm6 = vcmask 1046534   ;;  %vm139_vm7 = vcmask 1047559  }
  0x22   :  { %v100_v20 = vadd.f32 %v99_v14, %v98_v8  ;;  %v108_v21 = vrot.slane %v107_v15, 1  ;;  %v115_v22 = vrot.slane %v114_v16, 2  ;;  %v132_v23 = vsel %vm131_vm3, %v82_v12, %v130_v19 }
  0x23   :  { %v134_v24 = vsel %vm133_vm4, %v91_v18, %v132_v23 }
  0x24   :  { %v109_v25 = vadd.f32 %v108_v21, %v107_v15  ;;  %v116_v26 = vadd.f32 %v115_v22, %v114_v16  ;;  %v136_v27 = vsel %vm135_vm5, %v100_v20, %v134_v24 }
  0x26   :  { %v117_v28 = vrot.slane %v116_v26, 1  ;;  %v138_v29 = vsel %vm137_vm6, %v109_v25, %v136_v27 }
  0x28   :  { %v118_v31 = vadd.f32 %v117_v28, %v116_v26 }
  0x2a   :  { %v140_v32 = vsel %vm139_vm7, %v118_v31, %v138_v29 }
  0x2b   :  { %v142_v33 = vadd.f32 %v140_v32, %v29_v30 }
  0x2d   :  { %143 = vst.msk [vmem:[#allocation5] sm:$0xff] %vm27_vm0, %v142_v33 }
  0x2e   :  { %195 = shalt.err (!%p192_p9)
}
  0x2f   :  { %153 = dma.vmem_to_hbm [thread:$0]  %s151_s13, 128, %s251_s1, [#allocation4]  }
  0x30   :  { %206 = dma.done.wait [#allocation4], 128  }
  0x31   :  { %207 = vsyncadd [#allocation4], 4294967168 }
  0x32   :  { %157 = vsyncpa [#allocation3], 1 }
  0x33   :  { %158 = vsyncpa [#allocation4], 1 }

</bundles_post_ra>
